<compile_context>
chip_gen: v7x
topology: tpu7x:2x2x1
jax: 0.10.0
libtpu: 0.0.40
codegen_flags: <defaults>
</compile_context>

<pallas_src>
import functools
import math

import jax
import jax.numpy as jnp
import numpy as np
from jax.experimental import pallas as pl
from jax.experimental.pallas import tpu as pltpu


_MASK_VALUE = -0.7 * float(np.finfo(np.float32).max)   # finite, overflow-safe in f32


# --------------------------------------------------------------------------
# Small helpers: dtype-aware sublane alignment, tile picking, VMEM budget.
# --------------------------------------------------------------------------
def _sublane(dtype):
    """Minimum sublane tile: 8 for 4-byte, 16 for 2-byte, 32 for 1-byte dtypes."""
    return max(8, 32 // jnp.dtype(dtype).itemsize)


def _pick_tile(n, cap, align):
    """Largest divisor of n that is a multiple of `align` and <= cap.

    Returns n itself when n <= cap (a full-extent block is always layout-legal).
    TODO(synk): pad + mask a ragged last tile instead of the full-dim fallback.
    """
    if n <= cap:
        return n
    t = (cap // align) * align
    while t >= align:
        if n % t == 0:
            return t
        t -= align
    return n


@functools.lru_cache(maxsize=None)
def _vmem_limit():
    """Generation-aware scoped-VMEM budget (~96 MiB v5e/v6e, ~48 MiB v7x)."""
    try:
        cap = int(pltpu.get_tpu_info().vmem_capacity_bytes)
    except Exception:
        cap = 64 * 1024 * 1024            # conservative: v7x physical VMEM
    return int(min(cap * 3 // 4, 100 * 1024 * 1024))


# --------------------------------------------------------------------------
# Tiled matmul kernels (plain, and with a fused RoPE epilogue on the last
# K step).  x:(M,K) @ w:(K,N) -> (M,N), f32 VMEM accumulator.
# --------------------------------------------------------------------------
def _matmul_kernel(x_ref, w_ref, o_ref, acc_ref):
    @pl.when(pl.program_id(2) == 0)
    def _init():
        acc_ref[...] = jnp.zeros_like(acc_ref)

    acc_ref[...] += jnp.dot(x_ref[...], w_ref[...],
                            preferred_element_type=jnp.float32)

    @pl.when(pl.program_id(2) == pl.num_programs(2) - 1)
    def _store():
        o_ref[...] = acc_ref[...].astype(o_ref.dtype)


def _matmul_rope_kernel(x_ref, w_ref, cos_ref, sinp_ref, sinn_ref, o_ref, acc_ref,
                        *, half):
    @pl.when(pl.program_id(2) == 0)
    def _init():
        acc_ref[...] = jnp.zeros_like(acc_ref)

    acc_ref[...] += jnp.dot(x_ref[...], w_ref[...],
                            preferred_element_type=jnp.float32)

    @pl.when(pl.program_id(2) == pl.num_programs(2) - 1)
    def _rope_store():
        y = acc_ref[...]                               # (TM, TN), f32
        # rotate_half partners via full-width rolls; signs / zeros / pass-through
        # lanes are folded into the tables, so: no negate, no half-width slices,
        # no concatenate, single unmasked full-width store.
        # TODO(synk): route the rolls through pltpu.roll (XLU slot) for
        # 128-aligned tile widths once the hardware rotate direction is validated.
        y_prev = jnp.roll(y, half, axis=1)             # x[p - half]  (sinp lanes)
        y_next = jnp.roll(y, -half, axis=1)            # x[p + half]  (sinn lanes)
        y = (y * cos_ref[...].astype(jnp.float32)
             + y_prev * sinp_ref[...].astype(jnp.float32)
             + y_next * sinn_ref[...].astype(jnp.float32))
        o_ref[...] = y.astype(o_ref.dtype)


def linear(x, w, rope_tables=None, *, seq_len=None, half=None, head_dim=None,
           out_dtype=None, tm_cap=256, tn_cap=512, tk_cap=1024):
    """y = x @ w, M/N/K tiled with an f32 VMEM accumulator.

    If `rope_tables = (cos, sinp, sinn)` (each (seq_len, N)) is given, RoPE is
    applied as an epilogue on the last K step.  x rows must then be ordered
    (batch * seq_len) with the sequence contiguous inside each batch.
    """
    M, K = x.shape
    K2, N = w.shape
    assert K == K2
    out_dtype = out_dtype or x.dtype
    align_m = _sublane(x.dtype)

    if rope_tables is None:
        tm = _pick_tile(M, tm_cap, align_m)
        align_n = 128
    else:
        assert seq_len is not None and half is not None and head_dim is not None
        assert M % seq_len == 0
        # M tiles must not cross a batch boundary so the table row index is
        # simply (m-tile % tiles-per-sequence).
        tm = _pick_tile(seq_len, tm_cap, align_m)
        align_n = (128 * head_dim) // math.gcd(128, head_dim)

    tn = _pick_tile(N, tn_cap, align_n)
    tk = _pick_tile(K, tk_cap, 128)
    if rope_tables is not None:
        assert tn % head_dim == 0, "N tile must not split a head for fused RoPE"
    assert M % tm == 0 and N % tn == 0 and K % tk == 0
    grid = (M // tm, N // tn, K // tk)

    x_spec = pl.BlockSpec((tm, tk), lambda i, j, k: (i, k))
    w_spec = pl.BlockSpec((tk, tn), lambda i, j, k: (k, j))
    o_spec = pl.BlockSpec((tm, tn), lambda i, j, k: (i, j))
    scratch = [pltpu.VMEM((tm, tn), jnp.float32)]
    params = pltpu.CompilerParams(
        dimension_semantics=("parallel", "parallel", "arbitrary"),
        vmem_limit_bytes=_vmem_limit())

    if rope_tables is None:
        return pl.pallas_call(
            _matmul_kernel,
            out_shape=jax.ShapeDtypeStruct((M, N), out_dtype),
            grid=grid,
            in_specs=[x_spec, w_spec],
            out_specs=o_spec,
            scratch_shapes=scratch,
            compiler_params=params,
        )(x, w)

    cos, sinp, sinn = rope_tables
    sq = seq_len // tm
    t_spec = pl.BlockSpec((tm, tn), lambda i, j, k: (i % sq, j))
    kernel = functools.partial(_matmul_rope_kernel, half=half)
    return pl.pallas_call(
        kernel,
        out_shape=jax.ShapeDtypeStruct((M, N), out_dtype),
        grid=grid,
        in_specs=[x_spec, w_spec, t_spec, t_spec, t_spec],
        out_specs=o_spec,
        scratch_shapes=scratch,
        compiler_params=params,
    )(x, w, cos, sinp, sinn)


# --------------------------------------------------------------------------
# Flash-attention style causal GQA attention, operating directly on the
# lane-dense (B, S, heads*head_dim) layout (no transposes, no HBM round trips).
# --------------------------------------------------------------------------
def _flash_attn_kernel(q_ref, k_ref, v_ref, o_ref, m_ref, l_ref, acc_ref, *,
                       n_heads, n_kv_heads, head_dim, tq, tkv):
    """One (batch, q-tile, kv-tile) step of online-softmax causal attention.

    q_ref : (tq,  n_heads   * head_dim)  -- q already scaled by 1/sqrt(head_dim)
    k_ref : (tkv, n_kv_heads* head_dim)
    v_ref : (tkv, n_kv_heads* head_dim)
    o_ref : (tq,  n_heads   * head_dim)
    m/l   : (tq, n_heads) f32 running max / denominator
    acc   : (tq, n_heads*head_dim) f32 running numerator
    """
    qi = pl.program_id(1)
    kvi = pl.program_id(2)
    nkv = pl.num_programs(2)
    group = n_heads // n_kv_heads
    d = head_dim

    @pl.when(kvi == 0)
    def _init():
        m_ref[...] = jnp.full(m_ref.shape, _MASK_VALUE, m_ref.dtype)
        l_ref[...] = jnp.zeros_like(l_ref)
        acc_ref[...] = jnp.zeros_like(acc_ref)

    q_start = qi * tq
    kv_start = kvi * tkv

    # Causal block skip: KV tiles entirely above the diagonal contribute nothing
    # (their DMA is also elided by the clamped kv index_map in flash_attention()).
    @pl.when(kv_start < q_start + tq)
    def _compute():
        q_pos = q_start + jax.lax.broadcasted_iota(jnp.int32, (tq, tkv), 0)
        k_pos = kv_start + jax.lax.broadcasted_iota(jnp.int32, (tq, tkv), 1)
        causal = q_pos >= k_pos
        for g in range(n_kv_heads):
            # K/V for this kv head: loaded once, reused by all `group` q heads.
            k_g = k_ref[:, g * d:(g + 1) * d]                      # (tkv, d)
            v_g = v_ref[:, g * d:(g + 1) * d]
            for hh in range(group):
                h = g * group + hh
                q_h = q_ref[:, h * d:(h + 1) * d]                  # (tq, d)
                s = jax.lax.dot_general(
                    q_h, k_g, (((1,), (1,)), ((), ())),
                    preferred_element_type=jnp.float32)            # (tq, tkv)
                s = jnp.where(causal, s, _MASK_VALUE)

                m_prev = m_ref[:, h:h + 1]
                l_prev = l_ref[:, h:h + 1]
                m_new = jnp.maximum(m_prev, jnp.max(s, axis=-1, keepdims=True))
                alpha = jnp.exp(m_prev - m_new)
                p = jnp.exp(s - m_new)                             # f32
                l_ref[:, h:h + 1] = alpha * l_prev + jnp.sum(p, axis=-1,
                                                             keepdims=True)
                pv = jnp.dot(p.astype(v_g.dtype), v_g,
                             preferred_element_type=jnp.float32)   # (tq, d)
                acc_ref[:, h * d:(h + 1) * d] = (
                    alpha * acc_ref[:, h * d:(h + 1) * d] + pv)
                m_ref[:, h:h + 1] = m_new

    @pl.when(kvi == nkv - 1)
    def _finalize():
        for h in range(n_heads):
            inv = 1.0 / l_ref[:, h:h + 1]
            o_ref[:, h * d:(h + 1) * d] = (
                acc_ref[:, h * d:(h + 1) * d] * inv).astype(o_ref.dtype)


def flash_attention(q, k, v, *, n_heads, n_kv_heads, head_dim,
                    tq_cap=256, tkv_cap=512):
    """q:(B,S,H*D), k/v:(B,S,KVH*D) -> (B,S,H*D), causal, GQA, q pre-scaled."""
    B, S, qw = q.shape
    kw = k.shape[-1]
    assert qw == n_heads * head_dim and kw == n_kv_heads * head_dim
    assert n_heads % n_kv_heads == 0

    align = _sublane(q.dtype)
    tq = _pick_tile(S, tq_cap, align)
    tkv = _pick_tile(S, tkv_cap, align)
    nq, nkv = S // tq, S // tkv
    grid = (B, nq, nkv)

    def q_map(b, qi, kvi):
        return (b, qi, 0)

    def kv_map(b, qi, kvi):
        # Clamp to the last causally-needed KV block so skipped blocks repeat an
        # already-resident block index (their DMA is elided by the pipeline).
        last = ((qi + 1) * tq - 1) // tkv
        return (b, jnp.minimum(kvi, last), 0)

    kernel = functools.partial(
        _flash_attn_kernel, n_heads=n_heads, n_kv_heads=n_kv_heads,
        head_dim=head_dim, tq=tq, tkv=tkv)

    return pl.pallas_call(
        kernel,
        out_shape=jax.ShapeDtypeStruct((B, S, qw), q.dtype),
        grid=grid,
        in_specs=[
            pl.BlockSpec((None, tq, qw), q_map),
            pl.BlockSpec((None, tkv, kw), kv_map),
            pl.BlockSpec((None, tkv, kw), kv_map),
        ],
        out_specs=pl.BlockSpec((None, tq, qw), q_map),
        scratch_shapes=[
            pltpu.VMEM((tq, n_heads), jnp.float32),        # running max
            pltpu.VMEM((tq, n_heads), jnp.float32),        # running denominator
            pltpu.VMEM((tq, qw), jnp.float32),             # running numerator
        ],
        compiler_params=pltpu.CompilerParams(
            dimension_semantics=("parallel", "parallel", "arbitrary"),
            vmem_limit_bytes=_vmem_limit()),
    )(q, k, v)


# --------------------------------------------------------------------------
# Attention module (JAX/Pallas port of the PyTorch module's forward pass).
# --------------------------------------------------------------------------
class Attention:

    def __init__(self, dim, n_heads, n_kv_heads, max_seq_len=2048, theta=10000.0,
                 dropout=0.0, compute_dtype=jnp.float32, *, key):
        assert dim % n_heads == 0 and dim % n_kv_heads == 0
        assert n_heads % n_kv_heads == 0
        self.dim = dim
        self.n_heads = n_heads
        self.n_kv_heads = n_kv_heads
        self.head_dim = dim // n_heads
        self.max_seq_len = max_seq_len
        self.theta = float(theta)
        self.compute_dtype = compute_dtype
        # TODO(synk): attention dropout (dropout_p > 0) not implemented in the kernel.
        self.dropout_p = dropout
        D = self.head_dim
        assert D % 4 == 0, "head_dim must be divisible by 4 (rot_dim = head_dim // 2)"

        kq, kk, kv, ko = jax.random.split(key, 4)

        def init_linear(k, fan_in, fan_out):
            # (in, out) layout; PyTorch nn.Linear stores (out, in) and does x @ W.T.
            bound = 1.0 / math.sqrt(fan_in)
            w = jax.random.uniform(k, (fan_in, fan_out), jnp.float32, -bound, bound)
            return w.astype(compute_dtype)

        self.wq = init_linear(kq, dim, dim)
        self.wk = init_linear(kk, dim, n_kv_heads * D)
        self.wv = init_linear(kv, dim, n_kv_heads * D)
        self.wo = init_linear(ko, dim, dim)

        # ---- RoPE tables: built once, full lane width, sign/zero folded ----
        rot = D // 2                 # = freqs.shape[-1] in the PyTorch module
        half = rot // 2
        self.half = half
        inv_freqs = 1.0 / (self.theta ** (jnp.arange(0, D, 2, dtype=jnp.float32) / D))
        t = jnp.arange(max_seq_len, dtype=jnp.float32)
        ang = jnp.outer(t, inv_freqs)                            # (L, rot)
        cos, sin = jnp.cos(ang), jnp.sin(ang)
        L = max_seq_len
        zpass = jnp.zeros((L, D - rot), jnp.float32)
        # Per-head full-width (L, D) tables:
        #   lanes [0, half):      out = x*cos - x[p+half]*sin   -> sinn = -sin
        #   lanes [half, rot):    out = x*cos + x[p-half]*sin   -> sinp = +sin
        #   lanes [rot, D):       out = x (pass-through)        -> cos = 1, sin* = 0
        cos_h = jnp.concatenate([cos, jnp.ones((L, D - rot), jnp.float32)], axis=-1)
        sinp_h = jnp.concatenate(
            [jnp.zeros((L, half), jnp.float32), sin[:, half:], zpass], axis=-1)
        sinn_h = jnp.concatenate(
            [-sin[:, :half], jnp.zeros((L, rot - half), jnp.float32), zpass], axis=-1)

        def fold(n_h, scale):   # tile per-head tables across heads -> (L, n_h * D)
            return tuple(jnp.tile(tbl * scale, (1, n_h)).astype(compute_dtype)
                         for tbl in (cos_h, sinp_h, sinn_h))

        # The 1/sqrt(head_dim) attention scale is folded into the *q* tables, so
        # neither q nor the attention scores need a separate scaling pass.
        self.rope_q = fold(n_heads, 1.0 / math.sqrt(D))
        self.rope_k = fold(n_kv_heads, 1.0)

    def __call__(self, x):
        B, S, C = x.shape
        assert C == self.dim and S <= self.max_seq_len
        assert S % _sublane(self.compute_dtype) == 0, (
            "seq_len must be a multiple of the sublane tile "
            "(TODO(synk): pad + mask ragged sequence tails)")
        H, KVH, D = self.n_heads, self.n_kv_heads, self.head_dim

        x2 = x.reshape(B * S, C).astype(self.compute_dtype)
        rope_q = tuple(t[:S] for t in self.rope_q)
        rope_k = tuple(t[:S] for t in self.rope_k)

        # Projections with RoPE fused as an epilogue (q, k).  Everything stays in
        # the lane-dense (B*S, heads*head_dim) layout -- no transposes anywhere.
        q = linear(x2, self.wq, rope_q, seq_len=S, half=self.half, head_dim=D)
        k = linear(x2, self.wk, rope_k, seq_len=S, half=self.half, head_dim=D)
        v = linear(x2, self.wv)

        o = flash_attention(q.reshape(B, S, H * D),
                            k.reshape(B, S, KVH * D),
                            v.reshape(B, S, KVH * D),
                            n_heads=H, n_kv_heads=KVH, head_dim=D)

        # TODO(synk): use_cache / cached_keys buffers omitted (no effect on output).
        out = linear(o.reshape(B * S, H * D), self.wo)
        return out.reshape(B, S, C)


# --------------------------------------------------------------------------
# Pure-JAX reference mirroring the PyTorch forward (dropout = 0), for checking.
# --------------------------------------------------------------------------
def _reference_attention(x, attn):
    B, S, C = x.shape
    H, KVH, D = attn.n_heads, attn.n_kv_heads, attn.head_dim
    wq, wk, wv, wo = (w.astype(jnp.float32)
                      for w in (attn.wq, attn.wk, attn.wv, attn.wo))
    q = (x @ wq).reshape(B, S, H, D).transpose(0, 2, 1, 3)
    k = (x @ wk).reshape(B, S, KVH, D).transpose(0, 2, 1, 3)
    v = (x @ wv).reshape(B, S, KVH, D).transpose(0, 2, 1, 3)

    rot, half = D // 2, D // 4
    inv_freqs = 1.0 / (attn.theta ** (jnp.arange(0, D, 2, dtype=jnp.float32) / D))
    ang = jnp.outer(jnp.arange(S, dtype=jnp.float32), inv_freqs)
    cos, sin = jnp.cos(ang), jnp.sin(ang)                          # (S, rot)

    def rope(t):
        xr = t[..., :rot]
        rotated = jnp.concatenate([-xr[..., half:], xr[..., :half]], axis=-1)
        return jnp.concatenate([xr * cos + rotated * sin, t[..., rot:]], axis=-1)

    q, k = rope(q), rope(k)
    rep = H // KVH
    k = jnp.repeat(k, rep, axis=1)
    v = jnp.repeat(v, rep, axis=1)
    s = jnp.einsum('bhqd,bhkd->bhqk', q, k) / math.sqrt(D)
    mask = jnp.tril(jnp.ones((S, S), dtype=bool))
    s = jnp.where(mask, s, -1e30)
    p = jax.nn.softmax(s, axis=-1)
    o = jnp.einsum('bhqk,bhkd->bhqd', p, v)
    return o.transpose(0, 2, 1, 3).reshape(B, S, H * D) @ wo


if __name__ == "__main__":
    B, S = 2, 16
    dim, n_heads, n_kv_heads = 64, 4, 2          # head_dim = 16, rot_dim = 8
    key = jax.random.PRNGKey(0)
    kx, kw = jax.random.split(key)
    x = jax.random.normal(kx, (B, S, dim), dtype=jnp.float32)

    # f32 path: tight numerical check against the pure-JAX reference.
    attn_f32 = Attention(dim=dim, n_heads=n_heads, n_kv_heads=n_kv_heads,
                         max_seq_len=64, theta=10000.0, dropout=0.0,
                         compute_dtype=jnp.float32, key=kw)
    out_f32 = jax.block_until_ready(attn_f32(x))
    ref_f32 = _reference_attention(x, attn_f32)
    np.testing.assert_allclose(np.asarray(out_f32), np.asarray(ref_f32),
                               rtol=2e-2, atol=2e-2)

    # bf16 path (MXU-rate path from the perf review): looser check.
    attn_bf16 = Attention(dim=dim, n_heads=n_heads, n_kv_heads=n_kv_heads,
                          max_seq_len=64, theta=10000.0, dropout=0.0,
                          compute_dtype=jnp.bfloat16, key=kw)
    out_bf16 = jax.block_until_ready(attn_bf16(x))
    ref_bf16 = _reference_attention(x, attn_bf16)
    np.testing.assert_allclose(np.asarray(out_bf16).astype(np.float32),
                               np.asarray(ref_bf16), rtol=1e-1, atol=1e-1)

    print("KERNEL_OK")
</pallas_src>

<mosaic_0001>
module attributes {stable_mosaic.version = 11 : i64} {
  func.func @_matmul_rope_kernel(%arg0: i32, %arg1: i32, %arg2: i32, %arg3: memref<16x64xf32, #tpu.memory_space<vmem>>, %arg4: memref<64x64xf32, #tpu.memory_space<vmem>>, %arg5: memref<16x64xf32, #tpu.memory_space<vmem>>, %arg6: memref<16x64xf32, #tpu.memory_space<vmem>>, %arg7: memref<16x64xf32, #tpu.memory_space<vmem>>, %arg8: memref<16x64xf32, #tpu.memory_space<vmem>>, %arg9: memref<16x64xf32, #tpu.memory_space<vmem>>) attributes {dimension_semantics = [#tpu.dimension_semantics<parallel>, #tpu.dimension_semantics<parallel>, #tpu.dimension_semantics<arbitrary>], iteration_bounds = array<i64: 2, 1, 1>, scalar_prefetch = 0 : i64, scratch_operands = 1 : i64, tpu.core_type = #tpu.core_type<tc>, window_params = [{transform_indices = @transform_0, window_bounds = array<i64: 16, 64>}, {transform_indices = @transform_1, window_bounds = array<i64: 64, 64>}, {transform_indices = @transform_2, window_bounds = array<i64: 16, 64>}, {transform_indices = @transform_3, window_bounds = array<i64: 16, 64>}, {transform_indices = @transform_4, window_bounds = array<i64: 16, 64>}, {transform_indices = @transform_5, window_bounds = array<i64: 16, 64>}]} {
    %c0_i32 = arith.constant 0 : i32
    %0 = arith.cmpi eq, %arg2, %c0_i32 : i32
    %1 = arith.extui %0 : i1 to i32
    %c0_i32_0 = arith.constant 0 : i32
    %2 = arith.cmpi ne, %1, %c0_i32_0 : i32
    scf.if %2 {
      %cst_10 = arith.constant 0.000000e+00 : f32
      %12 = vector.broadcast %cst_10 : f32 to vector<16x64xf32>
      %c0_11 = arith.constant 0 : index
      %c0_12 = arith.constant 0 : index
      %13 = vector.load %arg9[%c0_11, %c0_12] : memref<16x64xf32, #tpu.memory_space<vmem>>, vector<16x64xf32>
      tpu.vector_store %arg9[%c0_11, %c0_12], %12 {strides = array<i32>} : memref<16x64xf32, #tpu.memory_space<vmem>>, vector<16x64xf32>,
    } else {
    }
    %c0 = arith.constant 0 : index
    %c0_1 = arith.constant 0 : index
    %3 = vector.load %arg9[%c0, %c0_1] : memref<16x64xf32, #tpu.memory_space<vmem>>, vector<16x64xf32>
    %c0_2 = arith.constant 0 : index
    %c0_3 = arith.constant 0 : index
    %4 = vector.load %arg3[%c0_2, %c0_3] : memref<16x64xf32, #tpu.memory_space<vmem>>, vector<16x64xf32>
    %c0_4 = arith.constant 0 : index
    %c0_5 = arith.constant 0 : index
    %5 = vector.load %arg4[%c0_4, %c0_5] : memref<64x64xf32, #tpu.memory_space<vmem>>, vector<64x64xf32>
    %cst = arith.constant dense<0.000000e+00> : vector<16x64xf32>
    %6 = tpu.matmul %4, %5, %cst {dimension_numbers = #tpu.dot_dimension_numbers<[1], [0], [0], [1], [0, 0, 1, 1], [], []>} : vector<16x64xf32>, vector<64x64xf32>, vector<16x64xf32> -> vector<16x64xf32>
    %7 = arith.addf %3, %6 : vector<16x64xf32>
    %c0_6 = arith.constant 0 : index
    %c0_7 = arith.constant 0 : index
    %8 = vector.load %arg9[%c0_6, %c0_7] : memref<16x64xf32, #tpu.memory_space<vmem>>, vector<16x64xf32>
    tpu.vector_store %arg9[%c0_6, %c0_7], %7 {strides = array<i32>} : memref<16x64xf32, #tpu.memory_space<vmem>>, vector<16x64xf32>,
    %c0_i32_8 = arith.constant 0 : i32
    %9 = arith.cmpi eq, %arg2, %c0_i32_8 : i32
    %10 = arith.extui %9 : i1 to i32
    %c0_i32_9 = arith.constant 0 : i32
    %11 = arith.cmpi ne, %10, %c0_i32_9 : i32
    scf.if %11 {
      %c0_10 = arith.constant 0 : index
      %c0_11 = arith.constant 0 : index
      %12 = vector.load %arg9[%c0_10, %c0_11] : memref<16x64xf32, #tpu.memory_space<vmem>>, vector<16x64xf32>
      %13 = vector.extract_strided_slice %12 {offsets = [0, 60], sizes = [16, 4], strides = [1, 1]} : vector<16x64xf32> to vector<16x4xf32>
      %14 = vector.extract_strided_slice %12 {offsets = [0, 0], sizes = [16, 60], strides = [1, 1]} : vector<16x64xf32> to vector<16x60xf32>
      %15 = tpu.concatenate %13, %14 in 1 : vector<16x4xf32>, vector<16x60xf32> -> vector<16x64xf32>
      %16 = vector.extract_strided_slice %12 {offsets = [0, 4], sizes = [16, 60], strides = [1, 1]} : vector<16x64xf32> to vector<16x60xf32>
      %17 = vector.extract_strided_slice %12 {offsets = [0, 0], sizes = [16, 4], strides = [1, 1]} : vector<16x64xf32> to vector<16x4xf32>
      %18 = tpu.concatenate %16, %17 in 1 : vector<16x60xf32>, vector<16x4xf32> -> vector<16x64xf32>
      %c0_12 = arith.constant 0 : index
      %c0_13 = arith.constant 0 : index
      %19 = vector.load %arg5[%c0_12, %c0_13] : memref<16x64xf32, #tpu.memory_space<vmem>>, vector<16x64xf32>
      %20 = arith.mulf %12, %19 : vector<16x64xf32>
      %c0_14 = arith.constant 0 : index
      %c0_15 = arith.constant 0 : index
      %21 = vector.load %arg6[%c0_14, %c0_15] : memref<16x64xf32, #tpu.memory_space<vmem>>, vector<16x64xf32>
      %22 = arith.mulf %15, %21 : vector<16x64xf32>
      %23 = arith.addf %20, %22 : vector<16x64xf32>
      %c0_16 = arith.constant 0 : index
      %c0_17 = arith.constant 0 : index
      %24 = vector.load %arg7[%c0_16, %c0_17] : memref<16x64xf32, #tpu.memory_space<vmem>>, vector<16x64xf32>
      %25 = arith.mulf %18, %24 : vector<16x64xf32>
      %26 = arith.addf %23, %25 : vector<16x64xf32>
      %c0_18 = arith.constant 0 : index
      %c0_19 = arith.constant 0 : index
      %27 = vector.load %arg8[%c0_18, %c0_19] : memref<16x64xf32, #tpu.memory_space<vmem>>, vector<16x64xf32>
      tpu.vector_store %arg8[%c0_18, %c0_19], %26 {strides = array<i32>} : memref<16x64xf32, #tpu.memory_space<vmem>>, vector<16x64xf32>,
    } else {
    }
    return
  }
  func.func @transform_0(%arg0: i32, %arg1: i32, %arg2: i32) -> (i32, i32) {
    %c0_i32 = arith.constant 0 : i32
    return %arg0, %arg2 : i32, i32
  }
  func.func @transform_1(%arg0: i32, %arg1: i32, %arg2: i32) -> (i32, i32) {
    %c0_i32 = arith.constant 0 : i32
    return %arg2, %arg1 : i32, i32
  }
  func.func @transform_2(%arg0: i32, %arg1: i32, %arg2: i32) -> (i32, i32) {
    %c1_i32 = arith.constant 1 : i32
    %c0_i32 = arith.constant 0 : i32
    %0 = arith.cmpi eq, %c1_i32, %c0_i32 : i32
    %c1_i32_0 = arith.constant 1 : i32
    %1 = arith.select %0, %c1_i32_0, %c1_i32 : i32
    %2 = arith.remsi %arg0, %1 : i32
    %c0_i32_1 = arith.constant 0 : i32
    %3 = arith.cmpi ne, %2, %c0_i32_1 : i32
    %c0_i32_2 = arith.constant 0 : i32
    %4 = arith.cmpi slt, %2, %c0_i32_2 : i32
    %c0_i32_3 = arith.constant 0 : i32
    %5 = arith.cmpi slt, %1, %c0_i32_3 : i32
    %6 = arith.xori %4, %5 : i1
    %7 = arith.andi %6, %3 : i1
    %8 = arith.addi %2, %1 : i32
    %9 = arith.select %7, %8, %2 : i32
    %c0_i32_4 = arith.constant 0 : i32
    return %9, %arg1 : i32, i32
  }
  func.func @transform_3(%arg0: i32, %arg1: i32, %arg2: i32) -> (i32, i32) {
    %c1_i32 = arith.constant 1 : i32
    %c0_i32 = arith.constant 0 : i32
    %0 = arith.cmpi eq, %c1_i32, %c0_i32 : i32
    %c1_i32_0 = arith.constant 1 : i32
    %1 = arith.select %0, %c1_i32_0, %c1_i32 : i32
    %2 = arith.remsi %arg0, %1 : i32
    %c0_i32_1 = arith.constant 0 : i32
    %3 = arith.cmpi ne, %2, %c0_i32_1 : i32
    %c0_i32_2 = arith.constant 0 : i32
    %4 = arith.cmpi slt, %2, %c0_i32_2 : i32
    %c0_i32_3 = arith.constant 0 : i32
    %5 = arith.cmpi slt, %1, %c0_i32_3 : i32
    %6 = arith.xori %4, %5 : i1
    %7 = arith.andi %6, %3 : i1
    %8 = arith.addi %2, %1 : i32
    %9 = arith.select %7, %8, %2 : i32
    %c0_i32_4 = arith.constant 0 : i32
    return %9, %arg1 : i32, i32
  }
  func.func @transform_4(%arg0: i32, %arg1: i32, %arg2: i32) -> (i32, i32) {
    %c1_i32 = arith.constant 1 : i32
    %c0_i32 = arith.constant 0 : i32
    %0 = arith.cmpi eq, %c1_i32, %c0_i32 : i32
    %c1_i32_0 = arith.constant 1 : i32
    %1 = arith.select %0, %c1_i32_0, %c1_i32 : i32
    %2 = arith.remsi %arg0, %1 : i32
    %c0_i32_1 = arith.constant 0 : i32
    %3 = arith.cmpi ne, %2, %c0_i32_1 : i32
    %c0_i32_2 = arith.constant 0 : i32
    %4 = arith.cmpi slt, %2, %c0_i32_2 : i32
    %c0_i32_3 = arith.constant 0 : i32
    %5 = arith.cmpi slt, %1, %c0_i32_3 : i32
    %6 = arith.xori %4, %5 : i1
    %7 = arith.andi %6, %3 : i1
    %8 = arith.addi %2, %1 : i32
    %9 = arith.select %7, %8, %2 : i32
    %c0_i32_4 = arith.constant 0 : i32
    return %9, %arg1 : i32, i32
  }
  func.func @transform_5(%arg0: i32, %arg1: i32, %arg2: i32) -> (i32, i32) {
    %c0_i32 = arith.constant 0 : i32
    return %arg0, %arg1 : i32, i32
  }
}

</mosaic_0001>

<bundles_post_ra>
// kernel: tpu_custom_call.1
= control target key start
LH: loop header
LB: loop body
LE: loop exit
PB: predicated region body
PF: predicated region fallthrough
CT: control target
= control target key end

     0   :  { %10 = vsyncpa [#allocation4], 0  ;;  %s1463_s0 = inlined_call_operand.hbm [shape: f32[32,64], index: 0, kind: input, shape index: {}]   ;;  %s1464_s1 = inlined_call_operand.hbm [shape: f32[64,64], index: 1, kind: input, shape index: {}]   ;;  %s1465_s2 = inlined_call_operand.hbm [shape: f32[16,64], index: 2, kind: input, shape index: {}]   ;;  %s1466_s3 = inlined_call_operand.hbm [shape: f32[16,64], index: 3, kind: input, shape index: {}]   ;;  %s1467_s4 = inlined_call_operand.hbm [shape: f32[16,64], index: 4, kind: input, shape index: {}]   ;;  %s1468_s5 = inlined_call_operand.hbm [shape: f32[32,64], index: 5, kind: output, shape index: {}]  }
   0x1   :  { %12 = vsyncpa [#allocation4 + $0x1], 0 }
   0x2   :  { %13 = vsyncpa [#allocation7], 0 }
   0x3   :  { %14 = vsyncpa [#allocation10], 0 }
   0x4   :  { %15 = vsyncpa [#allocation5], 0 }
   0x5   :  { %17 = vsyncpa [#allocation5 + $0x1], 0  ;;  %s1134_s18 = smov 0   ;;  %s1136_s19 = smov 0  }
   0x6   :  { %s1138_s20 = smov 0   ;;  %s1140_s21 = smov 0  }
   0x7   :  { %s1142_s22 = smov 0   ;;  %s1144_s23 = smov 0  }
   0x8 LB: > { %1475 = sst [smem:[#allocation17_spill]] %s1067_s18  ;;  %s671_s24 = sadd.s32 4294967295, %s1087_s23   ;;  %s1087_s23 = sphi %s1144_s23, %s23_s23   ;;  %s1083_s22 = sphi %s1142_s22, %s1498_s22   ;;  %s1079_s21 = sphi %s1140_s21, %s1497_s21   ;;  %s1075_s20 = sphi %s1138_s20, %s1496_s20   ;;  %s1071_s19 = sphi %s1136_s19, %s1495_s19   ;;  %s1067_s18 = sphi %s1134_s18, %s1494_s18  }
   0x9   : > { %s672_s25 = sadd.s32 4294967294, %s1087_s23   ;;  %p64_p0 = scmp.ne.s32.totalorder %s1071_s19, %s1067_s18 }
   0xa   : > { %p1168_p1 = scmp.eq.s32.totalorder %s671_s24, 0  ;;  %p1172_p2 = scmp.eq.s32.totalorder %s671_s24, 1 }
   0xb   : > { %p202_p3 = scmp.eq.s32.totalorder %s672_s25, 1  ;;  %p673_p5 = scmp.ge.s32.totalorder %s1087_s23, 1 }
   0xc   : > { %s1476_s26 = scalar_select %p1168_p1, 1, 0 }
   0xd   : > { %s1477_s27 = scalar_select %p1172_p2, 1, 0 }
   0xe   : > { %p1178_p4 = por %p1168_p1, %p64_p0  ;;  %p1183_p6 = por %p202_p3, %p64_p0 }
   0xf   : > { %p209_p7 = scmp.lt.s32.totalorder %s1087_s23, 3  ;;  %s1089_s6 = smov [#allocation6]  }
  0x10   : > { %s1478_s28 = scalar_select %p1178_p4, 1, 0 }
  0x11   : > { %s1479_s29 = scalar_select %p1183_p6, 1, 0 }
  0x12   : > { %p1188_p8 = pnand %p673_p5, %p209_p7  ;;  %s225_s7 = sshll.u32 %s1089_s6, 4  ;;  %s1192_s7 = int_to_ptr.vmem [resolvable:$true] %s225_s7 }
  0x13   : > { %1480 = sst [smem:[#allocation18_spill]] %s1479_s29  ;;  %s1090_s9 = smov [#allocation9]  }
  0x14   : > { %s1481_s30 = scalar_select %p1188_p8, 1, 0 }
  0x15   : > { %p763_p9 = pneg %p1188_p8  ;;  %s255_s10 = sshll.u32 %s1090_s9, 4  ;;  %s1203_s10 = int_to_ptr.vmem [resolvable:$true] %s255_s10 }
  0x16   : > { %s1091_s11 = smov [#allocation8]   ;;  %s855_s15 = scalar_lea.hbm %s1464_s1, 1024 }
  0x17   : > { %p1199_p11 = pnand %p763_p9, %p1168_p1  ;;  %s1205_s12 = sshll.u32 %s1091_s11, 4  ;;  %s241_s12 = int_to_ptr.vmem [resolvable:$true] %s1205_s12 }
  0x18   : > { %p856_p12 = scmp.ne.s32.totalorder %s1464_s1, %s855_s15  ;;  %p862_p5 = scmp.lt.u32.totalorder %s855_s15, %s1464_s1 }
  0x19   : > { %p1215_p13 = pneg %p1199_p11 }
  0x1b   : > { %p858_p0 = pnand %p1215_p13, %p856_p12 }
  0x1d   : > { %p859_p3 = pneg %p858_p0 }
  0x1f   : > { %p864_p7 = pnand %p862_p5, %p859_p3 }
  0x21   : > { %867 = shalt.err (!%p864_p7)
}
  0x22   : > { %s868_s9 = scalar_lea.vmem %s1192_s7, 1024  ;;  %p876_p1 = scmp.lt.s32.totalorder %s1192_s7, %s1192_s7 }
  0x23   : > { %p869_p9 = scmp.ne.s32.totalorder %s1192_s7, %s868_s9  ;;  %p877_p4 = scmp.lt.s32.totalorder %s868_s9, %s868_s9 }
  0x25   : > { %p871_p10 = pnand %p869_p9, %p1215_p13  ;;  %p878_p12 = por %p877_p4, %p876_p1 }
  0x27   : > { %p872_p6 = pneg %p871_p10 }
  0x29   : > { %p879_p0 = pnand %p878_p12, %p872_p6 }
  0x2b   : > { %882 = shalt.err (!%p879_p0)
}
  0x2c   : > { %s1092_s11 = smov 128   ;;  %s1093_s13 = smov 8  }
  0x2d   : > { %766 = dma.hbm_to_vmem [thread:$0]  (!%p1199_p11), %s1464_s1, 1024, %s1192_s7, [#allocation7], %s1092_s11, %s1092_s11, %s1093_s13  }
  0x2e   : > { %s883_s25 = scalar_lea.hbm %s1466_s3, 256 }
  0x2f   : > { %p884_p1 = scmp.ne.s32.totalorder %s1466_s3, %s883_s25  ;;  %p890_p10 = scmp.lt.u32.totalorder %s883_s25, %s1466_s3 }
  0x31   : > { %p886_p4 = pnand %p884_p1, %p1215_p13 }
  0x33   : > { %p887_p6 = pneg %p886_p4 }
  0x35   : > { %p892_p3 = pnand %p890_p10, %p887_p6 }
  0x37   : > { %895 = shalt.err (!%p892_p3)
}
  0x38   : > { %s896_s7 = scalar_lea.vmem %s1203_s10, 256  ;;  %p904_p12 = scmp.lt.s32.totalorder %s1203_s10, %s1203_s10 }
  0x39   : > { %p897_p5 = scmp.ne.s32.totalorder %s1203_s10, %s896_s7  ;;  %p905_p0 = scmp.lt.s32.totalorder %s896_s7, %s896_s7 }
  0x3b   : > { %p899_p7 = pnand %p897_p5, %p1215_p13  ;;  %p906_p1 = por %p905_p0, %p904_p12 }
  0x3d   : > { %p900_p9 = pneg %p899_p7 }
  0x3f   : > { %p907_p4 = pnand %p906_p1, %p900_p9 }
  0x41   : > { %910 = shalt.err (!%p907_p4)
}
  0x42   : > { %772 = dma.hbm_to_vmem [thread:$0]  (!%p1199_p11), %s1466_s3, 256, %s1203_s10, [#allocation10], %s1092_s11, %s1092_s11, %s1093_s13  }
  0x43   : > { %s911_s16 = scalar_lea.hbm %s1465_s2, 256 }
  0x44   : > { %p912_p6 = scmp.ne.s32.totalorder %s1465_s2, %s911_s16  ;;  %p918_p5 = scmp.lt.u32.totalorder %s911_s16, %s1465_s2 }
  0x46   : > { %p914_p10 = pnand %p912_p6, %p1215_p13 }
  0x48   : > { %p915_p3 = pneg %p914_p10 }
  0x4a   : > { %p920_p7 = pnand %p918_p5, %p915_p3 }
  0x4c   : > { %923 = shalt.err (!%p920_p7)
}
  0x4d   : > { %s924_s7 = scalar_lea.vmem %s241_s12, 256  ;;  %p932_p1 = scmp.lt.s32.totalorder %s241_s12, %s241_s12 }
  0x4e   : > { %p925_p9 = scmp.ne.s32.totalorder %s241_s12, %s924_s7  ;;  %p933_p4 = scmp.lt.s32.totalorder %s924_s7, %s924_s7 }
  0x50   : > { %p927_p12 = pnand %p925_p9, %p1215_p13  ;;  %p934_p8 = por %p933_p4, %p932_p1 }
  0x52   : > { %p928_p0 = pneg %p927_p12 }
  0x54   : > { %p935_p2 = pnand %p934_p8, %p928_p0 }
  0x56   : > { %938 = shalt.err (!%p935_p2)
}
  0x57   : > { %769 = dma.hbm_to_vmem [thread:$0]  (!%p1199_p11), %s1465_s2, 256, %s241_s12, [#allocation7], %s1092_s11, %s1092_s11, %s1093_s13  }
  0x58   : > { %s1094_s29 = smov [#allocation11]   ;;  %s939_s17 = scalar_lea.hbm %s1467_s4, 256 }
  0x59   : > { %s270_s14 = sshll.u32 %s1094_s29, 4  ;;  %p940_p2 = scmp.ne.s32.totalorder %s1467_s4, %s939_s17  ;;  %s271_s14 = int_to_ptr.vmem [resolvable:$true] %s270_s14 }
  0x5a   : > { %p946_p10 = scmp.lt.u32.totalorder %s939_s17, %s1467_s4 }
  0x5b   : > { %p942_p8 = pnand %p940_p2, %p1215_p13 }
  0x5d   : > { %p943_p6 = pneg %p942_p8 }
  0x5f   : > { %p948_p3 = pnand %p946_p10, %p943_p6 }
  0x61   : > { %951 = shalt.err (!%p948_p3)
}
  0x62   : > { %s952_s12 = scalar_lea.vmem %s271_s14, 256  ;;  %p960_p12 = scmp.lt.s32.totalorder %s271_s14, %s271_s14 }
  0x63   : > { %p953_p5 = scmp.ne.s32.totalorder %s271_s14, %s952_s12  ;;  %p961_p0 = scmp.lt.s32.totalorder %s952_s12, %s952_s12 }
  0x65   : > { %p955_p7 = pnand %p953_p5, %p1215_p13  ;;  %p962_p1 = por %p961_p0, %p960_p12 }
  0x67   : > { %p956_p9 = pneg %p955_p7 }
  0x69   : > { %p963_p4 = pnand %p962_p1, %p956_p9 }
  0x6b   : > { %966 = shalt.err (!%p963_p4)
}
  0x6c   : > { %775 = dma.hbm_to_vmem [thread:$0]  (!%p1199_p11), %s1467_s4, 256, %s271_s14, [#allocation10], %s1092_s11, %s1092_s11, %s1093_s13  }
  0x6d   : > { %s42_s24 = sadd.s32 1, %s1083_s22  ;;  %s51_s8 = sadd.s32 1, %s1075_s20 }
  0x6e   : > { %p44_p13 = scmp.ge.s32.totalorder %s42_s24, 2  ;;  %p58_p2 = scmp.ne.s32.totalorder %s1075_s20, %s1071_s19 }
  0x6f   : > { %p59_p8 = scmp.eq.s32.totalorder %s1087_s23, 0  ;;  %p788_p6 = scmp.lt.s32.totalorder %s1087_s23, 2 }
  0x70   : > { %s1500_s24 = smov (%p44_p13, %s42_s24), 0  ;;  %p1484_p3 = scmp.ne.s32.totalorder %s1477_s27, 0 }
  0x71   : > { %p60_p10 = por %p59_p8, %p58_p2  ;;  %s46_s15 = ssub.s32 %s1083_s22, %s1500_s24 }
  0x72   : > { %p1318_p5 = por %p1484_p3, %p58_p2  ;;  %s284_s16 = sand.u32 1, %s1075_s20  }
  0x73   : > { %p49_p7 = scmp.eq.s32.totalorder %s46_s15, 0  ;;  %s679_s14 = sshll.u32 %s284_s16, 4 }
  0x74   : > { %s696_s17 = sshll.u32 %s1083_s22, 8  ;;  %s288_s27 = scalar_lea.vmem [#allocation3], %s679_s14 }
  0x75   : > { %s1327_s25 = scalar_select %p49_p7, %s1075_s20, %s51_s8  }
  0x76   : > { %s1332_s7 = scalar_lea.hbm %s1463_s0, %s696_s17  ;;  %s296_s12 = sshll.u32 %s288_s27, 4  ;;  %s1340_s12 = int_to_ptr.vmem [resolvable:$true] %s296_s12 }
  0x77   : > { %p1336_p11 = pnand %p788_p6, %p60_p10  ;;  %s1342_s18 = scalar_lea.sflag [#allocation4], %s284_s16 }
  0x78   : > { %s967_s8 = scalar_lea.hbm %s1332_s7, 256  ;;  %s972_s17 = scalar_lea.hbm %s1463_s0, 512 }
  0x79   : > { %p968_p9 = scmp.ne.s32.totalorder %s1332_s7, %s967_s8  ;;  %p969_p12 = pneg %p1336_p11 }
  0x7a   : > { %p973_p4 = scmp.lt.u32.totalorder %s1332_s7, %s1463_s0  ;;  %p974_p13 = scmp.lt.u32.totalorder %s972_s17, %s967_s8 }
  0x7b   : > { %p970_p0 = pnand %p969_p12, %p968_p9  ;;  %p976_p8 = scmp.lt.u32.totalorder %s967_s8, %s1332_s7 }
  0x7c   : > { %p975_p2 = por %p974_p13, %p973_p4 }
  0x7d   : > { %p971_p1 = pneg %p970_p0 }
  0x7e   : > { %p977_p6 = por %p976_p8, %p975_p2 }
  0x80   : > { %p978_p10 = pnand %p977_p6, %p971_p1 }
  0x82   : > { %981 = shalt.err (!%p978_p10)
}
  0x83   : > { %s982_s16 = scalar_lea.vmem %s1340_s12, 256  ;;  %s1095_s27 = smov [#allocation3]  }
  0x84   : > { %p983_p3 = scmp.ne.s32.totalorder %s1340_s12, %s982_s16  ;;  %s987_s15 = sshll.u32 %s1095_s27, 4  ;;  %s988_s15 = int_to_ptr.vmem [resolvable:$false] %s987_s15 }
  0x85   : > { %s989_s14 = scalar_lea.vmem %s988_s15, 512  ;;  %p990_p0 = scmp.lt.s32.totalorder %s1340_s12, %s988_s15 }
  0x86   : > { %p985_p7 = pnand %p983_p3, %p969_p12  ;;  %p991_p4 = scmp.lt.s32.totalorder %s989_s14, %s982_s16 }
  0x88   : > { %p986_p9 = pneg %p985_p7  ;;  %p992_p13 = por %p991_p4, %p990_p0 }
  0x8a   : > { %p993_p2 = pnand %p992_p13, %p986_p9 }
  0x8c   : > { %996 = shalt.err (!%p993_p2)
}
  0x8d   : > { %779 = dma.hbm_to_vmem [thread:$0]  (!%p1336_p11), %s1332_s7, 256, %s1340_s12, %s1342_s18, %s1092_s11, %s1092_s11, %s1093_s13  }
  0x8e   : > { %p1487_p12 = scmp.ne.s32.totalorder %s1481_s30, 0 }
  0x8f   : > { %s1376_s8 = sand.u32 (!%p1487_p12), 1, %s1071_s19   ;;  %p1488_p1 = scmp.ne.s32.totalorder (!%p1487_p12), %s1478_s28, 0 }
  0x90   : > { %308 = sbr.rel (%p1487_p12) target bundleno = 545 (0x221), region = 40  ;;  %s683_s17 = sshll.u32 (!%p1487_p12), %s1376_s8, 4 }
  0x91   : > { %s311_s6 = scalar_lea.sflag (!%p1487_p12), [#allocation4], %s1376_s8  ;;  %s1382_s10 = scalar_lea.vmem (!%p1487_p12), [#allocation3], %s683_s17 }
  0x97   : > { %1050 = dma.done.wait (%p1488_p1), %s311_s6, 256  }
  0x98   : > { %1052 = vsyncadd (%p1488_p1), %s311_s6, 4294967040  ;;  %p1489_p11 = scmp.ne.s32.totalorder %s1476_s26, 0 }
  0x9a   : > { %1054 = dma.done.wait (%p1489_p11), [#allocation7], 1280  }
  0x9b   : > { %1056 = vsyncadd (%p1489_p11), [#allocation7], 4294966016 }
  0x9c   : > { %1058 = dma.done.wait (%p1489_p11), [#allocation10], 512  }
  0x9d   : > { %1060 = vsyncadd (%p1489_p11), [#allocation10], 4294966784  ;;  %vm364_vm0 = vcmask 523264   ;;  %v1096_v0 = vmov 0.0   ;;  %v371_v1 = vld [vmem:[#allocation6] sm:$0xff]  ;;  %v372_v2 = vld [vmem:[#allocation6 + $0x8] sm:$0xff] }
  0x9e   : > { %366 = vst.msk [vmem:[#allocation2 + $0x8] sm:$0xff] %vm364_vm0, %v1096_v0  ;;  %365 = vst.msk [vmem:[#allocation2] sm:$0xff] %vm364_vm0, %v1096_v0  ;;  %v373_v3 = vld [vmem:[#allocation6 + $0x10] sm:$0xff]  ;;  %v727_v4 = vpack.c.bf16 %v372_v2, %v371_v1  ;;  %v374_v5 = vld [vmem:[#allocation6 + $0x18] sm:$0xff]  ;;  %s1097_s26 = smov 4   ;;  %s1098_s28 = smov 68  }
  0x9f   : > { %v731_v6 = vpack.c.bf16 %v374_v5, %v373_v3  ;;  %v375_v7 = vld [vmem:[#allocation6 + $0x20] sm:$0xff]  ;;  %v376_v8 = vld [vmem:[#allocation6 + $0x28] sm:$0xff]  ;;  %v377_v11 = vld [vmem:[#allocation6 + $0x30] sm:$0xff]  ;;  %s1099_s30 = smov 124   ;;  %s1100_s11 = smov 60   ;;  %vm484_vm1 = vcmask 31744  }
  0xa0   : > { %v369_v9 = vld [vmem:[%s1382_s10] sm:$0xff]  ;;  %728 = vmatprep.subr.bf16.mxu0 %v727_v4  ;;  %v735_v10 = vpack.c.bf16 %v376_v8, %v375_v7  ;;  %v378_v12 = vld [vmem:[#allocation6 + $0x38] sm:$0xff]  ;;  %v503_v32 = vld [vmem:[#allocation8 + $0x8] sm:$0xff]  ;;  %vm499_vm2 = vcmask 490496   ;;  %s697_s13 = sshll.u32 %s1079_s21, 8  ;;  %s356_s7 = scalar_lea.vmem [#allocation12], %s683_s17 }
  0xa1   : > { %724 = vmatprep.mubr.msk.f32.mxu0 %vm364_vm0, %v369_v9  ;;  %730 = vmatpush3.bf16.msra.mxu0 %v727_v4  ;;  %v739_v13 = vpack.c.bf16 %v378_v12, %v377_v11  ;;  %v370_v14 = vld [vmem:[%s1382_s10 + $0x8] sm:$0xff]  ;;  %v506_v29 = vld [vmem:[#allocation9] sm:$0xff]  ;;  %v502_v33 = vld [vmem:[#allocation8] sm:$0xff]  ;;  %s535_s12 = sshll.u32 %s356_s7, 4  ;;  %s1410_s16 = scalar_lea.hbm %s1468_s5, %s697_s13  ;;  %s1412_s12 = int_to_ptr.vmem [resolvable:$true] %s535_s12 }
  0xa2   : > { %732 = vmatprep.subr.bf16.mxu0 %v731_v6  ;;  %v507_v27 = vld [vmem:[#allocation9 + $0x8] sm:$0xff]  ;;  %v513_v37 = vld [vmem:[#allocation11 + $0x8] sm:$0xff]  ;;  %v512_v38 = vld [vmem:[#allocation11] sm:$0xff]  ;;  %s521_s21 = scalar_lea.sflag [#allocation5], %s1376_s8  ;;  %s997_s27 = scalar_lea.vmem %s1412_s12, 256 }
  0xa3   : > { %p998_p8 = scmp.ne.s32.totalorder %s1412_s12, %s997_s27  ;;  %s1101_s15 = smov [#allocation12]  }
  0xa4   : > { %s1001_s14 = sshll.u32 %s1101_s15, 4  ;;  %s1002_s14 = int_to_ptr.vmem [resolvable:$false] %s1001_s14 }
  0xa5   : > { %734 = vmatpush3.bf16.msra.mxu0 %v731_v6  ;;  %v368_v15 = vld [vmem:[#allocation2 + $0x8] sm:$0xff]  ;;  %v367_v16 = vld [vmem:[#allocation2] sm:$0xff]  ;;  %p999_p6 = pnand %p998_p8, %p1318_p5  ;;  %s1003_s17 = scalar_lea.vmem %s1002_s14, 512 }
  0xa6   : > { %736 = vmatprep.subr.bf16.mxu0 %v735_v10  ;;  %p1004_p3 = scmp.lt.s32.totalorder %s1412_s12, %s1002_s14  ;;  %p1005_p7 = scmp.lt.s32.totalorder %s1003_s17, %s997_s27 }
  0xa7   : > { %p1000_p10 = pneg %p999_p6 }
  0xa8   : > { %p1006_p9 = por %p1005_p7, %p1004_p3 }
  0xa9   : > { %738 = vmatpush3.bf16.msra.mxu0 %v735_v10 }
  0xaa   : > { %740 = vmatprep.subr.bf16.mxu0 %v739_v13  ;;  %p1007_p0 = pnand %p1006_p9, %p1000_p10 }
  0xad   : > { %742 = vmatpush3.bf16.msra.mxu0 %v739_v13 }
  0xb0   : > { %725 = vmatmul.mubr.msk.f32.vlgmr.msra.gmra.mrb[0].mxu0 %vm364_vm0, %v370_v14 }
 0x183   : > { %v726_v17 = vpop.f32.mrb[0].mxu0 }
 0x184   : > { %v462_v18 = vadd.f32 %v726_v17, %v368_v15  ;;  %v452_v19 = vpop.f32.mrb[1].mxu0 }
 0x185   : > { %v461_v20 = vadd.f32 %v452_v19, %v367_v16 }
 0x186   : > { %464 = vst.msk [vmem:[#allocation2 + $0x8] sm:$0xff] %vm364_vm0, %v462_v18 }
 0x187   : > { %463 = vst.msk [vmem:[#allocation2] sm:$0xff] %vm364_vm0, %v461_v20 }
 0x18d   : > { %v469_v21 = vld [vmem:[#allocation2 + $0x8] sm:$0xff] }
 0x18e   : > { %480 = vrot.lane.b32.xlu1 %v469_v21, %s1097_s26  ;;  %474 = vrot.lane.b32.xlu0 %v469_v21, %s1098_s28  ;;  %v468_v22 = vld [vmem:[#allocation2] sm:$0xff]  ;;  %v505_v39 = vmul.f32 %v503_v32, %v469_v21 }
 0x18f   : > { %v504_v40 = vmul.f32 %v502_v33, %v468_v22 }
 0x192   : > { %489 = vrot.lane.b32.xlu1 %v469_v21, %s1099_s30  ;;  %472 = vrot.lane.b32.xlu0 %v468_v22, %s1098_s28 }
 0x196   : > { %478 = vrot.lane.b32.xlu1 %v468_v22, %s1097_s26  ;;  %487 = vrot.lane.b32.xlu0 %v468_v22, %s1099_s30 }
 0x19a   : > { %495 = vrot.lane.b32.xlu1 %v469_v21, %s1100_s11  ;;  %493 = vrot.lane.b32.xlu0 %v468_v22, %s1100_s11 }
 0x200   : > { %v481_v23 = vpop.permute.xlu1 %480  ;;  %v475_v24 = vpop.permute.xlu0 %474 }
 0x201   : > { %v486_v28 = vsel %vm484_vm1, %v475_v24, %v481_v23 }
 0x202   : > { %v509_v35 = vmul.f32 %v507_v27, %v486_v28 }
 0x204   : > { %v490_v25 = vpop.permute.xlu1 %489  ;;  %v473_v26 = vpop.permute.xlu0 %472  ;;  %v511_v45 = vadd.f32 %v509_v35, %v505_v39 }
 0x208   : > { %v479_v30 = vpop.permute.xlu1 %478  ;;  %v488_v31 = vpop.permute.xlu0 %487 }
 0x209   : > { %v485_v34 = vsel %vm484_vm1, %v473_v26, %v479_v30 }
 0x20a   : > { %v508_v36 = vmul.f32 %v506_v29, %v485_v34 }
 0x20c   : > { %v496_v41 = vpop.permute.xlu1 %495  ;;  %v494_v42 = vpop.permute.xlu0 %493  ;;  %v510_v46 = vadd.f32 %v508_v36, %v504_v40 }
 0x20d   : > { %v501_v43 = vsel %vm499_vm2, %v490_v25, %v496_v41  ;;  %v500_v44 = vsel %vm499_vm2, %v488_v31, %v494_v42 }
 0x20e   : > { %v515_v47 = vmul.f32 %v513_v37, %v501_v43  ;;  %v514_v48 = vmul.f32 %v512_v38, %v500_v44 }
 0x210   : > { %v517_v49 = vadd.f32 %v515_v47, %v511_v45  ;;  %v516_v50 = vadd.f32 %v514_v48, %v510_v46 }
 0x212   : > { %519 = vst.msk [vmem:[%s356_s7 + $0x8] sm:$0xff] %vm364_vm0, %v517_v49  ;;  %518 = vst.msk [vmem:[%s356_s7] sm:$0xff] %vm364_vm0, %v516_v50 }
 0x213   : > { %1010 = shalt.err (!%p1007_p0)
}
 0x214   : > { %s1011_s6 = scalar_lea.hbm %s1410_s16, 256  ;;  %s1015_s28 = scalar_lea.hbm %s1468_s5, 512 }
 0x215   : > { %p1012_p4 = scmp.ne.s32.totalorder %s1410_s16, %s1011_s6  ;;  %p1016_p12 = scmp.lt.u32.totalorder %s1410_s16, %s1468_s5 }
 0x216   : > { %p1017_p1 = scmp.lt.u32.totalorder %s1015_s28, %s1011_s6  ;;  %p1019_p8 = scmp.lt.u32.totalorder %s1011_s6, %s1410_s16 }
 0x217   : > { %p1013_p13 = pnand %p1012_p4, %p1318_p5 }
 0x218   : > { %p1018_p11 = por %p1017_p1, %p1016_p12 }
 0x219   : > { %p1014_p2 = pneg %p1013_p13 }
 0x21a   : > { %p1020_p6 = por %p1019_p8, %p1018_p11 }
 0x21c   : > { %p1021_p10 = pnand %p1020_p6, %p1014_p2 }
 0x21e   : > { %1024 = shalt.err (!%p1021_p10)
}
 0x21f   : > { %s1102_s13 = smov 128   ;;  %s1103_s7 = smov 8  }
 0x220   : > { %761 = dma.vmem_to_hbm [thread:$0]  (%p1318_p5), %s1412_s12, 256, %s1410_s16, %s521_s21, %s1102_s13, %s1102_s13, %s1103_s7  }
 0x221 PF: > { %s1490_s18 = sld [smem:[#allocation17_spill]]  ;;  %s1491_s9 = sld [smem:[#allocation18_spill]] }
 0x222   : > { %p1493_p7 = scmp.ge.s32.totalorder %s1087_s23, 2 }
 0x227   : > { %s550_s27 = sand.u32 1, %s1490_s18   ;;  %p1492_p3 = scmp.ne.s32.totalorder %s1491_s9, 0 }
 0x228   : > { %s551_s15 = scalar_lea.sflag [#allocation5], %s550_s27 }
 0x229   : > { %p781_p9 = pnand %p1493_p7, %p1492_p3 }
 0x22b   : > { %1062 = dma.done.wait (!%p781_p9), %s551_s15, 256  }
 0x22c   : > { %1064 = vsyncadd (!%p781_p9), %s551_s15, 4294967040  ;;  %s23_s23 = sadd.s32 1, %s1087_s23   ;;  %s1494_s18 = smov %s1071_s19 }
 0x22d   : > { %p20_p0 = scmp.ge.s32.totalorder %s23_s23, 4   ;;  %s1495_s19 = smov %s1075_s20 }
 0x22e   : > { %s1496_s20 = smov %s1327_s25  ;;  %s1497_s21 = smov %s1083_s22 }
 0x22f   : > { %s1498_s22 = smov %s1500_s24  ;;  %22 = sbr.rel (!%p20_p0) target bundleno = 8 (0x8), region = 113 }
 0x236   :  { %556 = vsyncpa [#allocation4], 1 }
 0x237   :  { %558 = vsyncpa [#allocation4 + $0x1], 1 }
 0x238   :  { %559 = vsyncpa [#allocation7], 1 }
 0x239   :  { %560 = vsyncpa [#allocation10], 1 }
 0x23a   :  { %561 = vsyncpa [#allocation5], 1 }
 0x23b   :  { %563 = vsyncpa [#allocation5 + $0x1], 1 }

</bundles_post_ra>
